<compile_context>
chip_gen: v7x
topology: tpu7x:2x2x1
jax: 0.10.0
libtpu: 0.0.40
codegen_flags: <defaults>
</compile_context>

<pallas_src>
import jax
import jax.numpy as jnp
from jax.experimental import pallas as pl
from jax.experimental.pallas import tpu as pltpu


def _default_act_bf16():
    # bf16 elementwise/transcendental path only on v6e / v7x; v5e (and older) VPU/EUP are f32-only.
    try:
        kind = jax.devices()[0].device_kind.lower()
    except Exception:
        return False
    return any(tag in kind for tag in ("v6", "v7", "7x"))


def _make_mlp_kernel(act_dtype, mxu_dtype):
    def mlp_kernel(x_ref, w1_ref, b1_ref, w2_ref, b2_ref, w3_ref, b3_ref, o_ref):
        # x_ref : (2, TB)   transposed input tile (features on sublanes, batch on lanes)
        # w1_ref: (64, 2)   b1_ref: (64, 1)
        # w2_ref: (64, 64)  b2_ref: (64, 1)   (w2 in mxu_dtype)
        # w3_ref: (64, 1)   b3_ref: (1,) scalar in SMEM
        # o_ref : (1, TB)   lane-dense output row
        xt = x_ref[...]                                                  # (2, TB) f32

        # ---- layer 1: depth-2 contraction on the VPU; pre-activation f32, tanh in act_dtype ----
        pre1 = (w1_ref[:, 0:1] * xt[0:1, :]
                + w1_ref[:, 1:2] * xt[1:2, :]
                + b1_ref[...])                                           # (64, TB) f32
        h1 = jnp.tanh(pre1.astype(act_dtype))                            # (64, TB) act_dtype

        # ---- layer 2: 64x64 on the MXU, bf16 operands (default), f32 accumulation ----
        pre2 = (jnp.dot(w2_ref[...], h1.astype(mxu_dtype),
                        preferred_element_type=jnp.float32)
                + b2_ref[...])                                           # (64, TB) f32
        h2 = jnp.tanh(pre2.astype(act_dtype))                            # (64, TB) act_dtype

        # ---- layer 3: 64->1 as VPU multiply + sublane reduction in f32 (unmasked lane-dense store) ----
        o_ref[...] = (jnp.sum(h2.astype(jnp.float32) * w3_ref[...],
                              axis=0, keepdims=True)
                      + b3_ref[0])                                       # (1, TB) f32

    return mlp_kernel


def mlp_forward(x, params, *, block_batch=4096, mxu_bf16=True, act_bf16=None):
    """x: (N, 2) f32.  params: w1(2,64), b1(1,64), w2(64,64), b2(1,64), w3(64,1), b3(1,1)."""
    w1, b1, w2, b2, w3, b3 = params
    n = x.shape[0]

    if act_bf16 is None:
        act_bf16 = _default_act_bf16()
    act_dtype = jnp.bfloat16 if act_bf16 else jnp.float32
    mxu_dtype = jnp.bfloat16 if mxu_bf16 else jnp.float32

    # --- batch tiling: big lane-dense tiles, but keep >= ~8 grid steps (megacore / pipeline) ---
    lane = 256
    block_batch = max(lane, (int(block_batch) // lane) * lane)   # multiple of 256
    block_batch = min(block_batch, 16384)                        # VMEM headroom even on v7x
    n_lane = pl.cdiv(n, lane) * lane
    tb = max(lane, min(block_batch, (n_lane // 8 // lane) * lane))
    n_pad = pl.cdiv(n, tb) * tb
    grid = (n_pad // tb,)

    # --- layout plumbing: one fused pad+transpose; kernel sees a lane-dense (2, n_pad) slab ---
    xt = jnp.pad(x.astype(jnp.float32).T, ((0, 0), (0, n_pad - n)))
    w1k = w1.T.astype(jnp.float32)                               # (64, 2)
    b1k = b1.reshape(64, 1).astype(jnp.float32)
    w2k = w2.T.astype(mxu_dtype)                                 # (64, 64)
    b2k = b2.reshape(64, 1).astype(jnp.float32)
    w3k = w3.reshape(64, 1).astype(jnp.float32)
    b3k = b3.reshape(1).astype(jnp.float32)                      # scalar -> SMEM

    const = lambda shape: pl.BlockSpec(shape, lambda i: (0, 0))  # VMEM-resident weights

    flops = 2 * n_pad * (2 * 64 + 64 * 64 + 64)
    transcendentals = 2 * 64 * n_pad
    bytes_accessed = (4 * 2 * n_pad + 4 * n_pad
                      + 4 * (64 * 2 + 64 + 64 + 64 + 1)
                      + int(jnp.dtype(mxu_dtype).itemsize) * 64 * 64)

    out_row = pl.pallas_call(
        _make_mlp_kernel(act_dtype, mxu_dtype),
        out_shape=jax.ShapeDtypeStruct((1, n_pad), jnp.float32),
        grid=grid,
        in_specs=[
            pl.BlockSpec((2, tb), lambda i: (0, i)),                  # x tile (batch on lanes)
            const((64, 2)),                                           # w1
            const((64, 1)),                                           # b1
            const((64, 64)),                                          # w2
            const((64, 1)),                                           # b2
            const((64, 1)),                                           # w3
            pl.BlockSpec(memory_space=pltpu.MemorySpace.SMEM),        # b3 scalar
        ],
        out_specs=pl.BlockSpec((1, tb), lambda i: (0, i)),            # lane-dense output row
        compiler_params=pltpu.CompilerParams(
            dimension_semantics=("parallel",),
            vmem_limit_bytes=32 * 1024 * 1024,
        ),
        cost_estimate=pl.CostEstimate(
            flops=flops, transcendentals=transcendentals, bytes_accessed=bytes_accessed
        ),
    )(xt, w1k, b1k, w2k, b2k, w3k, b3k)

    return out_row[0, :n].reshape(n, 1)


def init_params(key):
    # Deterministic init mimicking PyTorch Linear default: U(-1/sqrt(fan_in), 1/sqrt(fan_in)).
    ks = jax.random.split(key, 6)

    def linear(kw, kb, fan_in, fan_out):
        bound = 1.0 / jnp.sqrt(jnp.float32(fan_in))
        w = jax.random.uniform(kw, (fan_in, fan_out), jnp.float32, -bound, bound)
        b = jax.random.uniform(kb, (1, fan_out), jnp.float32, -bound, bound)
        return w, b

    w1, b1 = linear(ks[0], ks[1], 2, 64)
    w2, b2 = linear(ks[2], ks[3], 64, 64)
    w3, b3 = linear(ks[4], ks[5], 64, 1)
    return (w1, b1, w2, b2, w3, b3)


if __name__ == "__main__":
    key = jax.random.PRNGKey(0)
    pkey, xkey = jax.random.split(key)
    params = init_params(pkey)
    w1, b1, w2, b2, w3, b3 = params

    def ref_fn(xin):
        h1 = jnp.tanh(xin @ w1 + b1)
        h2 = jnp.tanh(h1 @ w2 + b2)
        return h2 @ w3 + b3

    # batch=8, in_features=2 (matches Linear(in_features=2, ...))
    x = jax.random.normal(xkey, (8, 2), jnp.float32)
    ref = ref_fn(x)

    # Strict f32 path (f32 MXU operands, f32 activations) -> tight tolerance.
    out_f32 = jax.block_until_ready(mlp_forward(x, params, mxu_bf16=False, act_bf16=False))
    assert out_f32.shape == (8, 1)
    assert jnp.allclose(out_f32, ref, atol=1e-4, rtol=1e-4), float(jnp.max(jnp.abs(out_f32 - ref)))

    # Multi-tile strict check (exercises padding + grid tiling).
    x_big = jax.random.normal(jax.random.PRNGKey(1), (300, 2), jnp.float32)
    ref_big = ref_fn(x_big)
    out_big = jax.block_until_ready(mlp_forward(x_big, params, mxu_bf16=False, act_bf16=False))
    assert out_big.shape == (300, 1)
    assert jnp.allclose(out_big, ref_big, atol=1e-4, rtol=1e-4), float(jnp.max(jnp.abs(out_big - ref_big)))

    # Fast default path (bf16 MXU operands everywhere; bf16 tanh on v6e/v7x) -> looser tolerance.
    out_fast = jax.block_until_ready(mlp_forward(x, params))
    assert out_fast.shape == (8, 1)
    assert jnp.allclose(out_fast, ref, atol=5e-2, rtol=5e-2), float(jnp.max(jnp.abs(out_fast - ref)))

    print("KERNEL_OK")
</pallas_src>

<mosaic_0001>
module attributes {stable_mosaic.version = 11 : i64} {
  func.func @mlp_kernel(%arg0: i32, %arg1: memref<2x256xf32, #tpu.memory_space<vmem>>, %arg2: memref<64x2xf32, #tpu.memory_space<vmem>>, %arg3: memref<64x1xf32, #tpu.memory_space<vmem>>, %arg4: memref<64x64xf32, #tpu.memory_space<vmem>>, %arg5: memref<64x1xf32, #tpu.memory_space<vmem>>, %arg6: memref<64x1xf32, #tpu.memory_space<vmem>>, %arg7: memref<1xf32, #tpu.memory_space<smem>>, %arg8: memref<1x256xf32, #tpu.memory_space<vmem>>) attributes {dimension_semantics = [#tpu.dimension_semantics<parallel>], iteration_bounds = array<i64: 1>, scalar_prefetch = 0 : i64, scratch_operands = 0 : i64, tpu.core_type = #tpu.core_type<tc>, window_params = [{transform_indices = @transform_0, window_bounds = array<i64: 2, 256>}, {pipeline_mode = #tpu.pipeline_mode<synchronous>, transform_indices = @transform_1, window_bounds = array<i64: 64, 2>}, {pipeline_mode = #tpu.pipeline_mode<synchronous>, transform_indices = @transform_2, window_bounds = array<i64: 64, 1>}, {pipeline_mode = #tpu.pipeline_mode<synchronous>, transform_indices = @transform_3, window_bounds = array<i64: 64, 64>}, {pipeline_mode = #tpu.pipeline_mode<synchronous>, transform_indices = @transform_4, window_bounds = array<i64: 64, 1>}, {pipeline_mode = #tpu.pipeline_mode<synchronous>, transform_indices = @transform_5, window_bounds = array<i64: 64, 1>}, {transform_indices = @transform_6, window_bounds = array<i64: 1>}, {transform_indices = @transform_7, window_bounds = array<i64: 1, 256>}]} {
    %c0 = arith.constant 0 : index
    %c0_0 = arith.constant 0 : index
    %0 = vector.load %arg1[%c0, %c0_0] : memref<2x256xf32, #tpu.memory_space<vmem>>, vector<2x256xf32>
    %c0_1 = arith.constant 0 : index
    %c0_2 = arith.constant 0 : index
    %1 = vector.load %arg2[%c0_1, %c0_2] : memref<64x2xf32, #tpu.memory_space<vmem>>, vector<64x1xf32>
    %2 = vector.extract_strided_slice %0 {offsets = [0, 0], sizes = [1, 256], strides = [1, 1]} : vector<2x256xf32> to vector<1x256xf32>
    %3 = vector.broadcast %1 : vector<64x1xf32> to vector<64x256xf32>
    %4 = vector.broadcast %2 : vector<1x256xf32> to vector<64x256xf32>
    %5 = arith.mulf %3, %4 : vector<64x256xf32>
    %c0_3 = arith.constant 0 : index
    %c1 = arith.constant 1 : index
    %6 = vector.load %arg2[%c0_3, %c1] : memref<64x2xf32, #tpu.memory_space<vmem>>, vector<64x1xf32>
    %7 = vector.extract_strided_slice %0 {offsets = [1, 0], sizes = [1, 256], strides = [1, 1]} : vector<2x256xf32> to vector<1x256xf32>
    %8 = vector.broadcast %6 : vector<64x1xf32> to vector<64x256xf32>
    %9 = vector.broadcast %7 : vector<1x256xf32> to vector<64x256xf32>
    %10 = arith.mulf %8, %9 : vector<64x256xf32>
    %11 = arith.addf %5, %10 : vector<64x256xf32>
    %c0_4 = arith.constant 0 : index
    %c0_5 = arith.constant 0 : index
    %12 = vector.load %arg3[%c0_4, %c0_5] : memref<64x1xf32, #tpu.memory_space<vmem>>, vector<64x1xf32>
    %13 = vector.broadcast %12 : vector<64x1xf32> to vector<64x256xf32>
    %14 = arith.addf %11, %13 : vector<64x256xf32>
    %15 = math.tanh %14 : vector<64x256xf32>
    %c0_6 = arith.constant 0 : index
    %c0_7 = arith.constant 0 : index
    %16 = vector.load %arg4[%c0_6, %c0_7] : memref<64x64xf32, #tpu.memory_space<vmem>>, vector<64x64xf32>
    %cst = arith.constant dense<0.000000e+00> : vector<64x256xf32>
    %17 = tpu.matmul %16, %15, %cst {dimension_numbers = #tpu.dot_dimension_numbers<[1], [0], [0], [1], [0, 0, 1, 1], [], []>} : vector<64x64xf32>, vector<64x256xf32>, vector<64x256xf32> -> vector<64x256xf32>
    %c0_8 = arith.constant 0 : index
    %c0_9 = arith.constant 0 : index
    %18 = vector.load %arg5[%c0_8, %c0_9] : memref<64x1xf32, #tpu.memory_space<vmem>>, vector<64x1xf32>
    %19 = vector.broadcast %18 : vector<64x1xf32> to vector<64x256xf32>
    %20 = arith.addf %17, %19 : vector<64x256xf32>
    %21 = math.tanh %20 : vector<64x256xf32>
    %c0_10 = arith.constant 0 : index
    %c0_11 = arith.constant 0 : index
    %22 = vector.load %arg6[%c0_10, %c0_11] : memref<64x1xf32, #tpu.memory_space<vmem>>, vector<64x1xf32>
    %23 = vector.broadcast %22 : vector<64x1xf32> to vector<64x256xf32>
    %24 = arith.mulf %21, %23 : vector<64x256xf32>
    %cst_12 = arith.constant dense<0.000000e+00> : vector<256xf32>
    %25 = vector.multi_reduction <add>, %24, %cst_12 [0] : vector<64x256xf32> to vector<256xf32>
    %26 = vector.shape_cast %25 : vector<256xf32> to vector<1x256xf32>
    %c0_13 = arith.constant 0 : index
    %27 = memref.load %arg7[%c0_13] : memref<1xf32, #tpu.memory_space<smem>>
    %28 = vector.broadcast %27 : f32 to vector<1x256xf32>
    %29 = arith.addf %26, %28 : vector<1x256xf32>
    %c0_14 = arith.constant 0 : index
    %c0_15 = arith.constant 0 : index
    %30 = vector.load %arg8[%c0_14, %c0_15] : memref<1x256xf32, #tpu.memory_space<vmem>>, vector<1x256xf32>
    tpu.vector_store %arg8[%c0_14, %c0_15], %29 {strides = array<i32>} : memref<1x256xf32, #tpu.memory_space<vmem>>, vector<1x256xf32>,
    return
  }
  func.func @transform_0(%arg0: i32) -> (i32, i32) {
    %c0_i32 = arith.constant 0 : i32
    %c0_i32_0 = arith.constant 0 : i32
    return %c0_i32, %arg0 : i32, i32
  }
  func.func @transform_1(%arg0: i32) -> (i32, i32) {
    %c0_i32 = arith.constant 0 : i32
    %c0_i32_0 = arith.constant 0 : i32
    %c0_i32_1 = arith.constant 0 : i32
    return %c0_i32, %c0_i32_0 : i32, i32
  }
  func.func @transform_2(%arg0: i32) -> (i32, i32) {
    %c0_i32 = arith.constant 0 : i32
    %c0_i32_0 = arith.constant 0 : i32
    %c0_i32_1 = arith.constant 0 : i32
    return %c0_i32, %c0_i32_0 : i32, i32
  }
  func.func @transform_3(%arg0: i32) -> (i32, i32) {
    %c0_i32 = arith.constant 0 : i32
    %c0_i32_0 = arith.constant 0 : i32
    %c0_i32_1 = arith.constant 0 : i32
    return %c0_i32, %c0_i32_0 : i32, i32
  }
  func.func @transform_4(%arg0: i32) -> (i32, i32) {
    %c0_i32 = arith.constant 0 : i32
    %c0_i32_0 = arith.constant 0 : i32
    %c0_i32_1 = arith.constant 0 : i32
    return %c0_i32, %c0_i32_0 : i32, i32
  }
  func.func @transform_5(%arg0: i32) -> (i32, i32) {
    %c0_i32 = arith.constant 0 : i32
    %c0_i32_0 = arith.constant 0 : i32
    %c0_i32_1 = arith.constant 0 : i32
    return %c0_i32, %c0_i32_0 : i32, i32
  }
  func.func @transform_6(%arg0: i32) -> i32 {
    %c0_i32 = arith.constant 0 : i32
    %c0_i32_0 = arith.constant 0 : i32
    return %c0_i32 : i32
  }
  func.func @transform_7(%arg0: i32) -> (i32, i32) {
    %c0_i32 = arith.constant 0 : i32
    %c0_i32_0 = arith.constant 0 : i32
    return %c0_i32, %arg0 : i32, i32
  }
}

</mosaic_0001>

<bundles_post_ra>
// kernel: tpu_custom_call.1
= control target key start
LH: loop header
LB: loop body
LE: loop exit
PB: predicated region body
PF: predicated region fallthrough
CT: control target
= control target key end

     0   :  { %v750_v2 = vmov 1   ;;  %v751_v7 = vmov 0   ;;  %s1006_s0 = inlined_call_operand.vmem [shape: f32[2,256], index: 0, kind: input, shape index: {}]   ;;  %s1007_s1 = inlined_call_operand.vmem [shape: f32[64,2], index: 1, kind: input, shape index: {}]   ;;  %s1008_s2 = inlined_call_operand.vmem [shape: f32[64,1], index: 2, kind: input, shape index: {}]   ;;  %s1009_s3 = inlined_call_operand.vmem [shape: f32[64,64], index: 3, kind: input, shape index: {}]   ;;  %s1010_s4 = inlined_call_operand.vmem [shape: f32[64,1], index: 4, kind: input, shape index: {}]   ;;  %s1011_s5 = inlined_call_operand.vmem [shape: f32[64,1], index: 5, kind: input, shape index: {}]   ;;  %s1012_s6 = inlined_call_operand.<no memory space> [shape: f32[1], index: 6, kind: input, shape index: {}]   ;;  %s1013_s7 = inlined_call_operand.hbm [shape: f32[1,256], index: 7, kind: output, shape index: {}]  }
   0x1   :  { %v31_v0 = vld [vmem:[%s1007_s1 + $0x10] sm:$0xff]  ;;  %v29_v1 = vld [vmem:[%s1007_s1] sm:$0xff]  ;;  %654 = vset.pattern.permute.xlu0 %v750_v2  ;;  %652 = vset.pattern.permute.xlu1 %v750_v2  ;;  %v30_v4 = vld [vmem:[%s1007_s1 + $0x8] sm:$0xff] }
   0x2   :  { %121 = vperm.xlu0 %654, %v31_v0   ;;  %113 = vperm.xlu1 %652, %v29_v1   ;;  %v33_v3 = vld [vmem:[%s1007_s1 + $0x20] sm:$0xff]  ;;  %v35_v5 = vld [vmem:[%s1007_s1 + $0x30] sm:$0xff]  ;;  %v32_v6 = vld [vmem:[%s1007_s1 + $0x18] sm:$0xff] }
   0x6   :  { %129 = vperm.xlu0 %654, %v33_v3   ;;  %117 = vperm.xlu1 %652, %v30_v4  }
   0xa   :  { %137 = vperm.xlu0 %654, %v35_v5   ;;  %653 = vset.pattern.permute.xlu1 %v751_v7 }
   0xb   :  { %54 = vperm.xlu1 %653, %v32_v6  }
   0xc   :  { %13 = vsyncpa [#allocation4], 0  ;;  %v194_v8 = vld [vmem:[%s1008_s2] sm:$0xff]  ;;  %v195_v9 = vld [vmem:[%s1008_s2 + $0x8] sm:$0xff]  ;;  %v752_v31 = vmov 0.0   ;;  %v78_v35 = vlaneseq  ;;  %vm330_vm0 = vcmask 523264  }
   0xd   :  { %v34_v10 = vld [vmem:[%s1007_s1 + $0x28] sm:$0xff]  ;;  %v197_v11 = vld [vmem:[%s1008_s2 + $0x18] sm:$0xff]  ;;  %v282_v13 = vld [vmem:[%s1010_s4] sm:$0xff]  ;;  %419 = vmatprep.mubr.f32.mxu0 %v752_v31  ;;  %443 = vmatprep.mubr.f32.mxu1 %v752_v31  ;;  %s754_s8 = smov [#allocation3]  }
   0xe   :  { %659 = vset.pattern.permute.xlu0 %v751_v7  ;;  %v199_v12 = vld [vmem:[%s1008_s2 + $0x28] sm:$0xff]  ;;  %v196_v14 = vld [vmem:[%s1008_s2 + $0x10] sm:$0xff]  ;;  %v286_v16 = vld [vmem:[%s1010_s4 + $0x20] sm:$0xff]  ;;  %v894_v38 = vshrl.u32 %v78_v35, 7  ;;  %s607_s9 = sshll.u32 %s754_s8, 4  ;;  %vm598_vm1 = vcmp.lt.s32.totalorder %v78_v35, 256  ;;  %s608_s9 = int_to_ptr.vmem [resolvable:$true] %s607_s9 }
   0xf   :  { %39 = vperm.xlu0 %659, %v29_v1   ;;  %655 = vset.pattern.permute.xlu1 %v750_v2  ;;  %v284_v15 = vld [vmem:[%s1010_s4 + $0x10] sm:$0xff]  ;;  %v36_v17 = vld [vmem:[%s1007_s1 + $0x38] sm:$0xff]  ;;  %v484_v19 = vld [vmem:[%s1011_s5] sm:$0xff]  ;;  %s726_s10 = scalar_lea.vmem %s608_s9, 32  ;;  %p731_p1 = scmp.lt.s32.totalorder %s608_s9, %s608_s9 }
  0x10   :  { %125 = vperm.xlu1 %655, %v32_v6   ;;  %v288_v18 = vld [vmem:[%s1010_s4 + $0x30] sm:$0xff]  ;;  %v198_v20 = vld [vmem:[%s1008_s2 + $0x20] sm:$0xff]  ;;  %v201_v24 = vld [vmem:[%s1008_s2 + $0x38] sm:$0xff]  ;;  %v146_v41 = vsub.s32 1, %v894_v38  ;;  %v80_v42 = vsub.s32 0, %v894_v38  ;;  %v150_v43 = vsub.s32 3, %v894_v38  ;;  %p727_p0 = scmp.ne.s32.totalorder %s608_s9, %s726_s10  ;;  %p732_p2 = scmp.lt.s32.totalorder %s726_s10, %s726_s10 }
  0x11   :  { %v486_v21 = vld [vmem:[%s1011_s5 + $0x10] sm:$0xff]  ;;  %v488_v23 = vld [vmem:[%s1011_s5 + $0x20] sm:$0xff]  ;;  %v283_v26 = vld [vmem:[%s1010_s4 + $0x8] sm:$0xff]  ;;  %v84_v45 = vsub.s32 2, %v894_v38 }
  0x12   :  { %v200_v22 = vld [vmem:[%s1008_s2 + $0x30] sm:$0xff]  ;;  %v285_v27 = vld [vmem:[%s1010_s4 + $0x18] sm:$0xff]  ;;  %v287_v28 = vld [vmem:[%s1010_s4 + $0x28] sm:$0xff]  ;;  %p733_p3 = por %p732_p2, %p731_p1 }
  0x13   :  { %44 = vperm.xlu0 %659, %v30_v4   ;;  %v490_v25 = vld [vmem:[%s1011_s5 + $0x30] sm:$0xff]  ;;  %v289_v29 = vld [vmem:[%s1010_s4 + $0x38] sm:$0xff]  ;;  %v485_v30 = vld [vmem:[%s1011_s5 + $0x8] sm:$0xff] }
  0x14   :  { %656 = vset.pattern.permute.xlu1 %v751_v7  ;;  %v487_v32 = vld [vmem:[%s1011_s5 + $0x18] sm:$0xff]  ;;  %v489_v33 = vld [vmem:[%s1011_s5 + $0x28] sm:$0xff]  ;;  %v28_v44 = vld [vmem:[%s1006_s0] sm:$0xf]  ;;  %p734_p4 = pnand %p733_p3, %p727_p0 }
  0x15   :  { %204 = vperm.xlu1 %656, %v194_v8   ;;  %v491_v34 = vld [vmem:[%s1011_s5 + $0x38] sm:$0xff]  ;;  %v147_v48 = vrot.slane %v28_v44, %v146_v41  ;;  %v81_v49 = vrot.slane %v28_v44, %v80_v42  ;;  %v151_v50 = vrot.slane %v28_v44, %v150_v43  ;;  %v85_v51 = vrot.slane %v28_v44, %v84_v45 }
  0x17   :  { %49 = vperm.xlu0 %659, %v31_v0   ;;  %v907_v53 = vrot.slane %v147_v48, %v146_v41  ;;  %v909_v54 = vrot.slane %v81_v49, %v80_v42  ;;  %v911_v56 = vrot.slane %v151_v50, %v146_v41  ;;  %v913_v57 = vrot.slane %v85_v51, %v80_v42 }
  0x19   :  { %59 = vperm.xlu1 %656, %v33_v3  }
  0x1b   :  { %209 = vperm.xlu0 %659, %v195_v9  }
  0x1d   :  { %64 = vperm.xlu1 %656, %v34_v10  }
  0x1f   :  { %219 = vperm.xlu0 %659, %v197_v11  }
  0x21   :  { %657 = vset.pattern.permute.xlu1 %v750_v2 }
  0x22   :  { %133 = vperm.xlu1 %657, %v34_v10  }
  0x23   :  { %229 = vperm.xlu0 %659, %v199_v12  }
  0x26   :  { %658 = vset.pattern.permute.xlu1 %v751_v7 }
  0x27   :  { %292 = vperm.xlu0 %659, %v282_v13   ;;  %214 = vperm.xlu1 %658, %v196_v14  }
  0x2b   :  { %302 = vperm.xlu0 %659, %v284_v15   ;;  %69 = vperm.xlu1 %658, %v35_v5  }
  0x2f   :  { %312 = vperm.xlu0 %659, %v286_v16   ;;  %74 = vperm.xlu1 %658, %v36_v17  }
  0x33   :  { %322 = vperm.xlu0 %659, %v288_v18   ;;  %660 = vset.pattern.permute.xlu1 %v750_v2 }
  0x34   :  { %141 = vperm.xlu1 %660, %v36_v17  }
  0x37   :  { %494 = vperm.xlu0 %659, %v484_v19  }
  0x38   :  { %661 = vset.pattern.permute.xlu1 %v751_v7 }
  0x39   :  { %224 = vperm.xlu1 %661, %v198_v20  }
  0x3b   :  { %504 = vperm.xlu0 %659, %v486_v21  }
  0x3d   :  { %234 = vperm.xlu1 %661, %v200_v22  }
  0x3f   :  { %514 = vperm.xlu0 %659, %v488_v23  }
  0x41   :  { %239 = vperm.xlu1 %661, %v201_v24  }
  0x43   :  { %524 = vperm.xlu0 %659, %v490_v25  }
  0x45   :  { %297 = vperm.xlu1 %661, %v283_v26  }
  0x49   :  { %307 = vperm.xlu1 %661, %v285_v27  }
  0x4d   :  { %317 = vperm.xlu1 %661, %v287_v28  }
  0x51   :  { %327 = vperm.xlu1 %661, %v289_v29  }
  0x55   :  { %499 = vperm.xlu1 %661, %v485_v30  }
  0x59   :  { %509 = vperm.xlu1 %661, %v487_v32  }
  0x5d   :  { %519 = vperm.xlu1 %661, %v489_v33  }
  0x61   :  { %529 = vperm.xlu1 %661, %v491_v34  }
  0x81   :  { %v114_v36 = vpop.permute.xlu1 %113  ;;  %v122_v37 = vpop.permute.xlu0 %121 }
  0x82   :  { %v162_v61 = vmul.f32 %v907_v53, %v114_v36  ;;  %v163_v62 = vmul.f32 %v911_v56, %v114_v36  ;;  %v166_v18 = vmul.f32 %v907_v53, %v122_v37  ;;  %v167_v20 = vmul.f32 %v911_v56, %v122_v37 }
  0x85   :  { %v118_v39 = vpop.permute.xlu1 %117  ;;  %v896_v40 = vpop.permute.xlu0 %129 }
  0x86   :  { %v164_v5 = vmul.f32 %v907_v53, %v118_v39  ;;  %v165_v6 = vmul.f32 %v911_v56, %v118_v39 }
  0x89   :  { %v905_v46 = vpop.permute.xlu0 %137 }
  0x8a   :  { %v55_v47 = vpop.permute.xlu1 %54 }
  0x8b   :  { %v102_v19 = vmul.f32 %v909_v54, %v55_v47  ;;  %v103_v21 = vmul.f32 %v913_v57, %v55_v47 }
  0x8e   :  { %v40_v52 = vpop.permute.xlu0 %39 }
  0x8f   :  { %v126_v55 = vpop.permute.xlu1 %125  ;;  %v96_v58 = vmul.f32 %v909_v54, %v40_v52  ;;  %v97_v59 = vmul.f32 %v913_v57, %v40_v52 }
  0x90   :  { %v168_v16 = vmul.f32 %v907_v53, %v126_v55  ;;  %v169_v17 = vmul.f32 %v911_v56, %v126_v55 }
  0x91   :  { %v178_v2 = vadd.f32 %v162_v61, %v96_v58  ;;  %v179_v3 = vadd.f32 %v163_v62, %v97_v59  ;;  %v171_v61 = vmul.f32 %v911_v56, %v896_v40 }
  0x92   :  { %v45_v60 = vpop.permute.xlu0 %44  ;;  %v184_v26 = vadd.f32 %v168_v16, %v102_v19  ;;  %v185_v27 = vadd.f32 %v169_v17, %v103_v21 }
  0x93   :  { %v98_v0 = vmul.f32 %v909_v54, %v45_v60  ;;  %v99_v1 = vmul.f32 %v913_v57, %v45_v60  ;;  %v170_v60 = vmul.f32 %v907_v53, %v896_v40 }
  0x94   :  { %v205_v63 = vpop.permute.xlu1 %204 }
  0x95   :  { %v242_v7 = vadd.f32 %v205_v63, %v178_v2  ;;  %v243_v8 = vadd.f32 %v205_v63, %v179_v3  ;;  %v180_v10 = vadd.f32 %v164_v5, %v98_v0  ;;  %v181_v11 = vadd.f32 %v165_v6, %v99_v1 }
  0x96   :  { %v50_v4 = vpop.permute.xlu0 %49 }
  0x97   :  { %662 = vtanh.f32 %v242_v7  ;;  %v100_v22 = vmul.f32 %v909_v54, %v50_v4  ;;  %v101_v23 = vmul.f32 %v913_v57, %v50_v4 }
  0x98   :  { %v60_v9 = vpop.permute.xlu1 %59  ;;  %664 = vtanh.f32 %v243_v8 }
  0x99   :  { %v182_v32 = vadd.f32 %v166_v18, %v100_v22  ;;  %v183_v33 = vadd.f32 %v167_v20, %v101_v23  ;;  %v104_v62 = vmul.f32 %v909_v54, %v60_v9  ;;  %v105_v63 = vmul.f32 %v913_v57, %v60_v9 }
  0x9a   :  { %v210_v12 = vpop.permute.xlu0 %209  ;;  %v174_v9 = vmul.f32 %v907_v53, %v905_v46 }
  0x9b   :  { %v244_v13 = vadd.f32 %v210_v12, %v180_v10  ;;  %v245_v14 = vadd.f32 %v210_v12, %v181_v11  ;;  %v186_v10 = vadd.f32 %v170_v60, %v104_v62  ;;  %v187_v11 = vadd.f32 %v171_v61, %v105_v63 }
  0x9c   :  { %v65_v15 = vpop.permute.xlu1 %64 }
  0x9d   :  { %666 = vtanh.f32 %v244_v13  ;;  %v106_v50 = vmul.f32 %v909_v54, %v65_v15  ;;  %v107_v51 = vmul.f32 %v913_v57, %v65_v15  ;;  %v175_v15 = vmul.f32 %v911_v56, %v905_v46 }
  0x9e   :  { %668 = vtanh.f32 %v245_v14  ;;  %v220_v24 = vpop.permute.xlu0 %219 }
  0x9f   :  { %v248_v28 = vadd.f32 %v220_v24, %v184_v26  ;;  %v249_v30 = vadd.f32 %v220_v24, %v185_v27 }
  0xa1   :  { %v134_v25 = vpop.permute.xlu1 %133  ;;  %v663_v29 = vpop.eup %662  ;;  %670 = vtanh.f32 %v248_v28 }
  0xa2   :  { %v665_v34 = vpop.eup %664  ;;  %672 = vtanh.f32 %v249_v30  ;;  %v172_v47 = vmul.f32 %v907_v53, %v134_v25  ;;  %v173_v48 = vmul.f32 %v911_v56, %v134_v25  ;;  %v230_v2 = vpop.permute.xlu0 %229 }
  0xa4   :  { %v188_v52 = vadd.f32 %v172_v47, %v106_v50  ;;  %v189_v58 = vadd.f32 %v173_v48, %v107_v51  ;;  %v280_v47 = vld [vmem:[%s1009_s3 + $0x30] sm:$0xff]  ;;  %v277_v48 = vld [vmem:[%s1009_s3 + $0x18] sm:$0xff] }
  0xa6   :  { %v215_v36 = vpop.permute.xlu1 %214  ;;  %v252_v4 = vadd.f32 %v230_v2, %v188_v52  ;;  %v253_v6 = vadd.f32 %v230_v2, %v189_v58  ;;  %v293_v50 = vpop.permute.xlu0 %292 }
  0xa7   :  { %v667_v39 = vpop.eup %666  ;;  %v246_v41 = vadd.f32 %v215_v36, %v182_v32  ;;  %v247_v37 = vadd.f32 %v215_v36, %v183_v33 }
  0xa8   :  { %v669_v42 = vpop.eup %668  ;;  %v625_v43 = vpack.c.bf16 %v667_v39, %v663_v29 }
  0xa9   :  { %v623_v44 = vpack.c.bf16 %v669_v42, %v665_v34  ;;  %674 = vtanh.f32 %v246_v41  ;;  %v278_v42 = vld [vmem:[%s1009_s3 + $0x20] sm:$0xff] }
  0xaa   :  { %v70_v45 = vpop.permute.xlu1 %69  ;;  %676 = vtanh.f32 %v247_v37  ;;  %v274_v37 = vld [vmem:[%s1009_s3] sm:$0xff]  ;;  %v303_v52 = vpop.permute.xlu0 %302 }
  0xab   :  { %624 = vmatprep.subr.bf16.mxu0 %v623_v44  ;;  %639 = vmatprep.subr.bf16.mxu1 %v623_v44  ;;  %v671_v55 = vpop.eup %670  ;;  %v108_v8 = vmul.f32 %v909_v54, %v70_v45  ;;  %v109_v12 = vmul.f32 %v913_v57, %v70_v45  ;;  %678 = vtanh.f32 %v252_v4  ;;  %v279_v44 = vld [vmem:[%s1009_s3 + $0x28] sm:$0xff]  ;;  %v276_v45 = vld [vmem:[%s1009_s3 + $0x10] sm:$0xff] }
  0xac   :  { %626 = vmatpush1.bf16.msra.mxu0 %v625_v43  ;;  %643 = vmatpush1.bf16.msra.mxu1 %v625_v43  ;;  %v673_v59 = vpop.eup %672  ;;  %680 = vtanh.f32 %v253_v6  ;;  %v275_v43 = vld [vmem:[%s1009_s3 + $0x8] sm:$0xff] }
  0xad   :  { %v190_v18 = vadd.f32 %v174_v9, %v108_v8  ;;  %v191_v20 = vadd.f32 %v175_v15, %v109_v12 }
  0xae   :  { %v75_v49 = vpop.permute.xlu1 %74  ;;  %v313_v58 = vpop.permute.xlu0 %312 }
  0xaf   :  { %v110_v21 = vmul.f32 %v909_v54, %v75_v49  ;;  %v111_v22 = vmul.f32 %v913_v57, %v75_v49  ;;  %v281_v49 = vld [vmem:[%s1009_s3 + $0x38] sm:$0xff] }
  0xb3   :  { %v142_v0 = vpop.permute.xlu1 %141  ;;  %v675_v1 = vpop.eup %674 }
  0xb4   :  { %v677_v3 = vpop.eup %676  ;;  %v629_v5 = vpack.c.bf16 %v671_v55, %v675_v1  ;;  %v176_v16 = vmul.f32 %v907_v53, %v142_v0  ;;  %v177_v17 = vmul.f32 %v911_v56, %v142_v0  ;;  %v323_v1 = vpop.permute.xlu0 %322 }
  0xb5   :  { %v627_v7 = vpack.c.bf16 %v673_v59, %v677_v3  ;;  %v679_v53 = vpop.eup %678 }
  0xb6   :  { %v192_v25 = vadd.f32 %v176_v16, %v110_v21  ;;  %v193_v26 = vadd.f32 %v177_v17, %v111_v22  ;;  %v681_v56 = vpop.eup %680 }
  0xb7   :  { %628 = vmatprep.subr.bf16.mxu0 %v627_v7  ;;  %640 = vmatprep.subr.bf16.mxu1 %v627_v7 }
  0xb8   :  { %v225_v40 = vpop.permute.xlu1 %224  ;;  %630 = vmatpush1.bf16.msra.mxu0 %v629_v5  ;;  %644 = vmatpush1.bf16.msra.mxu1 %v629_v5  ;;  %v495_v16 = vpop.permute.xlu0 %494 }
  0xb9   :  { %v250_v13 = vadd.f32 %v225_v40, %v186_v10  ;;  %v251_v14 = vadd.f32 %v225_v40, %v187_v11 }
  0xbb   :  { %682 = vtanh.f32 %v250_v13 }
  0xbc   :  { %684 = vtanh.f32 %v251_v14  ;;  %v235_v19 = vpop.permute.xlu1 %234 }
  0xbd   :  { %v254_v23 = vadd.f32 %v235_v19, %v190_v18  ;;  %v255_v24 = vadd.f32 %v235_v19, %v191_v20 }
  0xbf   :  { %686 = vtanh.f32 %v254_v23 }
  0xc0   :  { %v240_v27 = vpop.permute.xlu1 %239  ;;  %688 = vtanh.f32 %v255_v24 }
  0xc1   :  { %v256_v46 = vadd.f32 %v240_v27, %v192_v25  ;;  %v257_v28 = vadd.f32 %v240_v27, %v193_v26 }
  0xc3   :  { %690 = vtanh.f32 %v256_v46 }
  0xc4   :  { %692 = vtanh.f32 %v257_v28  ;;  %v298_v51 = vpop.permute.xlu1 %297 }
  0xc5   :  { %v683_v29 = vpop.eup %682 }
  0xc6   :  { %v685_v30 = vpop.eup %684  ;;  %v633_v32 = vpack.c.bf16 %v679_v53, %v683_v29 }
  0xc7   :  { %v631_v33 = vpack.c.bf16 %v681_v56, %v685_v30 }
  0xc8   :  { %v308_v55 = vpop.permute.xlu1 %307 }
  0xc9   :  { %632 = vmatprep.subr.bf16.mxu0 %v631_v33  ;;  %641 = vmatprep.subr.bf16.mxu1 %v631_v33  ;;  %v687_v54 = vpop.eup %686  ;;  %v505_v33 = vpop.permute.xlu0 %504 }
  0xca   :  { %634 = vmatpush1.bf16.msra.mxu0 %v633_v32  ;;  %645 = vmatpush1.bf16.msra.mxu1 %v633_v32  ;;  %v689_v57 = vpop.eup %688 }
  0xcc   :  { %v318_v59 = vpop.permute.xlu1 %317 }
  0xcd   :  { %v691_v34 = vpop.eup %690 }
  0xce   :  { %v693_v36 = vpop.eup %692  ;;  %v637_v39 = vpack.c.bf16 %v691_v34, %v687_v54 }
  0xcf   :  { %v635_v41 = vpack.c.bf16 %v693_v36, %v689_v57 }
  0xd0   :  { %v328_v8 = vpop.permute.xlu1 %327 }
  0xd1   :  { %636 = vmatprep.subr.bf16.mxu0 %v635_v41  ;;  %642 = vmatprep.subr.bf16.mxu1 %v635_v41 }
  0xd2   :  { %638 = vmatpush1.bf16.msra.mxu0 %v637_v39  ;;  %646 = vmatpush1.bf16.msra.mxu1 %v637_v39 }
  0xd4   :  { %v500_v26 = vpop.permute.xlu1 %499 }
  0xd5   :  { %615 = vmatmul.mubr.msk.f32.vlgmr.msra.gmra.mrb[0].mxu0 %vm330_vm0, %v274_v37  ;;  %619 = vmatmul.mubr.msk.f32.vlgmr.msra.gmra.mrb[0].mxu1 %vm330_vm0, %v278_v42 }
  0xd6   :  { %425 = vmatprep.mubr.f32.mxu0 %v752_v31  ;;  %449 = vmatprep.mubr.f32.mxu1 %v752_v31 }
  0xd8   :  { %v510_v41 = vpop.permute.xlu1 %509 }
  0xd9   :  { %616 = vmatmul.mubr.msk.f32.gmra.mrb[2].mxu0 %vm330_vm0, %v275_v43  ;;  %620 = vmatmul.mubr.msk.f32.gmra.mrb[2].mxu1 %vm330_vm0, %v279_v44 }
  0xda   :  { %431 = vmatprep.mubr.f32.mxu0 %v752_v31  ;;  %455 = vmatprep.mubr.f32.mxu1 %v752_v31 }
  0xdd   :  { %617 = vmatmul.mubr.msk.f32.gmra.mrb[4].mxu0 %vm330_vm0, %v276_v45  ;;  %621 = vmatmul.mubr.msk.f32.gmra.mrb[4].mxu1 %vm330_vm0, %v280_v47 }
  0xde   :  { %437 = vmatprep.mubr.f32.mxu0 %v752_v31  ;;  %461 = vmatprep.mubr.f32.mxu1 %v752_v31 }
  0xe1   :  { %618 = vmatmul.mubr.msk.f32.gmra.mrb[6].mxu0 %vm330_vm0, %v277_v48  ;;  %622 = vmatmul.mubr.msk.f32.gmra.mrb[6].mxu1 %vm330_vm0, %v281_v49 }
 0x1a8   :  { %v421_v60 = vpop.f32.mrb[0].mxu0  ;;  %v445_v31 = vpop.f32.mrb[0].mxu1 }
 0x1a9   :  { %v422_v61 = vadd.f32 %v421_v60, %v293_v50  ;;  %v423_v62 = vpop.f32.mrb[1].mxu0  ;;  %v447_v63 = vpop.f32.mrb[1].mxu1  ;;  %v446_v10 = vadd.f32 %v445_v31, %v313_v58 }
 0x1aa   :  { %v424_v0 = vadd.f32 %v423_v62, %v293_v50  ;;  %v448_v14 = vadd.f32 %v447_v63, %v313_v58  ;;  %v515_v50 = vpop.permute.xlu0 %514 }
 0x1ab   :  { %694 = vtanh.f32 %v422_v61 }
 0x1ac   :  { %v427_v2 = vpop.f32.mrb[2].mxu0  ;;  %v451_v3 = vpop.f32.mrb[2].mxu1  ;;  %696 = vtanh.f32 %v424_v0 }
 0x1ad   :  { %v428_v4 = vadd.f32 %v427_v2, %v298_v51  ;;  %v429_v5 = vpop.f32.mrb[3].mxu0  ;;  %v453_v6 = vpop.f32.mrb[3].mxu1  ;;  %v452_v17 = vadd.f32 %v451_v3, %v318_v59 }
 0x1ae   :  { %v430_v7 = vadd.f32 %v429_v5, %v298_v51  ;;  %v454_v23 = vadd.f32 %v453_v6, %v318_v59  ;;  %v520_v59 = vpop.permute.xlu1 %519  ;;  %v525_v6 = vpop.permute.xlu0 %524 }
 0x1af   :  { %698 = vtanh.f32 %v428_v4 }
 0x1b0   :  { %v433_v11 = vpop.f32.mrb[4].mxu0  ;;  %v457_v12 = vpop.f32.mrb[4].mxu1  ;;  %700 = vtanh.f32 %v430_v7 }
 0x1b1   :  { %v434_v40 = vadd.f32 %v433_v11, %v303_v52  ;;  %v435_v9 = vpop.f32.mrb[5].mxu0  ;;  %v459_v13 = vpop.f32.mrb[5].mxu1  ;;  %v458_v27 = vadd.f32 %v457_v12, %v323_v1 }
 0x1b2   :  { %v436_v15 = vadd.f32 %v435_v9, %v303_v52  ;;  %v460_v28 = vadd.f32 %v459_v13, %v323_v1 }
 0x1b3   :  { %702 = vtanh.f32 %v434_v40  ;;  %v530_v40 = vpop.permute.xlu1 %529 }
 0x1b4   :  { %704 = vtanh.f32 %v446_v10  ;;  %v439_v18 = vpop.f32.mrb[6].mxu0  ;;  %v463_v19 = vpop.f32.mrb[6].mxu1 }
 0x1b5   :  { %706 = vtanh.f32 %v436_v15  ;;  %v440_v20 = vadd.f32 %v439_v18, %v308_v55  ;;  %v441_v21 = vpop.f32.mrb[7].mxu0  ;;  %v465_v22 = vpop.f32.mrb[7].mxu1  ;;  %v464_v56 = vadd.f32 %v463_v19, %v328_v8 }
 0x1b6   :  { %708 = vtanh.f32 %v448_v14  ;;  %v442_v24 = vadd.f32 %v441_v21, %v308_v55  ;;  %v695_v25 = vpop.eup %694  ;;  %v466_v54 = vadd.f32 %v465_v22, %v328_v8 }
 0x1b7   :  { %710 = vtanh.f32 %v440_v20  ;;  %v697_v46 = vpop.eup %696  ;;  %v532_v29 = vmul.f32 %v695_v25, %v495_v16 }
 0x1b8   :  { %712 = vtanh.f32 %v452_v17  ;;  %v533_v57 = vmul.f32 %v697_v46, %v495_v16 }
 0x1b9   :  { %v699_v53 = vpop.eup %698  ;;  %714 = vtanh.f32 %v442_v24 }
 0x1ba   :  { %v534_v30 = vmul.f32 %v699_v53, %v500_v26  ;;  %716 = vtanh.f32 %v454_v23  ;;  %v701_v32 = vpop.eup %700 }
 0x1bb   :  { %718 = vtanh.f32 %v458_v27  ;;  %v535_v36 = vmul.f32 %v701_v32, %v500_v26  ;;  %v753_v27 = vmov 1966171168  }
 0x1bc   :  { %v548_v34 = vadd.f32 %v534_v30, %v532_v29  ;;  %720 = vtanh.f32 %v460_v28  ;;  %v582_v46 = vunpack.c.l.s4 %v753_v27 }
 0x1bd   :  { %v703_v39 = vpop.eup %702  ;;  %722 = vtanh.f32 %v464_v56  ;;  %v561_v42 = vadd.f32 %v535_v36, %v533_v57  ;;  %v575_v56 = vstv %s1012_s6 }
 0x1be   :  { %v705_v37 = vpop.eup %704  ;;  %v536_v43 = vmul.f32 %v703_v39, %v505_v33  ;;  %724 = vtanh.f32 %v466_v54  ;;  %v583_v32 = vunpack.c.0.s8 %v582_v46 }
 0x1bf   :  { %v707_v44 = vpop.eup %706  ;;  %v540_v31 = vmul.f32 %v705_v37, %v515_v50 }
 0x1c0   :  { %v709_v45 = vpop.eup %708  ;;  %v549_v47 = vadd.f32 %v548_v34, %v536_v43  ;;  %v537_v48 = vmul.f32 %v707_v44, %v505_v33  ;;  %v586_v34 = vsub.s32 %v583_v32, %v894_v38 }
 0x1c1   :  { %v711_v49 = vpop.eup %710  ;;  %v541_v1 = vmul.f32 %v709_v45, %v515_v50 }
 0x1c2   :  { %v713_v51 = vpop.eup %712  ;;  %v562_v52 = vadd.f32 %v561_v42, %v537_v48  ;;  %v538_v55 = vmul.f32 %v711_v49, %v510_v41 }
 0x1c3   :  { %v715_v58 = vpop.eup %714  ;;  %v542_v2 = vmul.f32 %v713_v51, %v520_v59 }
 0x1c4   :  { %v717_v60 = vpop.eup %716  ;;  %v550_v61 = vadd.f32 %v549_v47, %v538_v55  ;;  %v539_v62 = vmul.f32 %v715_v58, %v510_v41 }
 0x1c5   :  { %v719_v63 = vpop.eup %718  ;;  %v543_v7 = vmul.f32 %v717_v60, %v520_v59 }
 0x1c6   :  { %v721_v0 = vpop.eup %720  ;;  %v551_v3 = vadd.f32 %v550_v61, %v540_v31  ;;  %v563_v4 = vadd.f32 %v562_v52, %v539_v62  ;;  %v544_v8 = vmul.f32 %v719_v63, %v525_v6 }
 0x1c7   :  { %v723_v5 = vpop.eup %722  ;;  %v545_v9 = vmul.f32 %v721_v0, %v525_v6 }
 0x1c8   :  { %v552_v10 = vadd.f32 %v551_v3, %v542_v2  ;;  %v564_v11 = vadd.f32 %v563_v4, %v541_v1  ;;  %v725_v12 = vpop.eup %724  ;;  %v546_v13 = vmul.f32 %v723_v5, %v530_v40 }
 0x1c9   :  { %v547_v17 = vmul.f32 %v725_v12, %v530_v40 }
 0x1ca   :  { %v553_v14 = vadd.f32 %v552_v10, %v544_v8  ;;  %v565_v15 = vadd.f32 %v564_v11, %v543_v7 }
 0x1cc   :  { %v554_v16 = vadd.f32 %v553_v14, %v546_v13  ;;  %v566_v18 = vadd.f32 %v565_v15, %v545_v9 }
 0x1ce   :  { %v555_v19 = vrot.slane %v554_v16, 4  ;;  %v567_v20 = vadd.f32 %v566_v18, %v547_v17 }
 0x1d0   :  { %v568_v21 = vrot.slane %v567_v20, 4  ;;  %v556_v22 = vadd.f32 %v555_v19, %v554_v16 }
 0x1d2   :  { %v557_v23 = vrot.slane %v556_v22, 2  ;;  %v569_v24 = vadd.f32 %v568_v21, %v567_v20 }
 0x1d4   :  { %v558_v25 = vadd.f32 %v557_v23, %v556_v22  ;;  %v570_v26 = vrot.slane %v569_v24, 2 }
 0x1d6   :  { %v559_v28 = vrot.slane %v558_v25, 1  ;;  %v571_v53 = vadd.f32 %v570_v26, %v569_v24 }
 0x1d8   :  { %v560_v29 = vadd.f32 %v559_v28, %v558_v25  ;;  %v572_v30 = vrot.slane %v571_v53, 1 }
 0x1da   :  { %v573_v33 = vadd.f32 %v572_v30, %v571_v53  ;;  %v576_v54 = vadd.f32 %v575_v56, %v560_v29 }
 0x1dc   :  { %v577_v57 = vadd.f32 %v575_v56, %v573_v33 }
 0x1de   :  { %v580_v36 = vcombine.low %v576_v54, %v577_v57 }
 0x1e0   :  { %v587_v39 = vrot.slane %v580_v36, %v586_v34 }
 0x1e2   :  { %v594_v41 = vrot.slane %v587_v39, %v586_v34 }
 0x1e4   :  { %600 = vst.msk [vmem:[#allocation3] sm:$0x3] %vm598_vm1, %v594_v41 }
 0x1e5   :  { %737 = shalt.err (!%p734_p4)
}
 0x1e6   :  { %s738_s12 = scalar_lea.hbm %s1013_s7, 32 }
 0x1e7   :  { %p739_p5 = scmp.ne.s32.totalorder %s1013_s7, %s738_s12  ;;  %p742_p6 = scmp.lt.u32.totalorder %s738_s12, %s1013_s7 }
 0x1e9   :  { %p744_p7 = pnand %p742_p6, %p739_p5 }
 0x1eb   :  { %747 = shalt.err (!%p744_p7)
}
 0x1ec   :  { %610 = dma.vmem_to_hbm [thread:$0]  %s608_s9, 32, %s1013_s7, [#allocation4]  }
 0x1ed   :  { %748 = dma.done.wait [#allocation4], 32  }
 0x1ee   :  { %749 = vsyncadd [#allocation4], 4294967264 }
 0x1ef   :  { %614 = vsyncpa [#allocation4], 1 }

</bundles_post_ra>
